<compile_context>
chip_gen: v5e
topology: v5e:2x2
jax: 0.10.0
libtpu: 0.0.40
codegen_flags: <defaults>
</compile_context>

<pallas_src>
import jax
import jax.numpy as jnp
import numpy as np
from jax.experimental import pallas as pl
from jax.experimental.pallas import tpu as pltpu


def _round_up(x, m):
    return (x + m - 1) // m * m


def cbow_kernel(ids_ref, emb_ref, bias_ref, out_ref, acc_ref):
    vi = pl.program_id(1)

    @pl.when(vi == 0)
    def _init():
        acc_ref[...] = jnp.zeros_like(acc_ref)

    ids = ids_ref[...]                                   # (Bt, S) int32
    bt, seq = ids.shape
    vt = emb_ref.shape[0]
    v_off = vi * vt

    # Bag-of-words counts against the current vocab tile, built as a 2-D
    # (Bt, Vt) tensor with V on the lane axis: S cheap VPU compare+adds
    # (no 3-D one-hot, no cross-sublane reduction).
    lane_ids = jax.lax.broadcasted_iota(jnp.int32, (bt, vt), 1) + v_off
    counts = jnp.zeros((bt, vt), jnp.float32)
    for s in range(seq):                                 # static unroll, S is small
        counts = counts + (lane_ids == ids[:, s:s + 1]).astype(jnp.float32)

    # sum_s E_folded[ids[b, s]]  ==  counts[b, :] @ E_folded   (one MXU matmul,
    # bf16 inputs, f32 accumulation).
    acc_ref[...] += jnp.dot(counts.astype(emb_ref.dtype), emb_ref[...],
                            preferred_element_type=jnp.float32)

    @pl.when(vi == pl.num_programs(1) - 1)
    def _finalize():
        out_ref[...] = (acc_ref[...] + bias_ref[...]).astype(out_ref.dtype)


def cbow_forward(ids, emb_table, weight, bias, *, block_v=None,
                 fold_dtype=jnp.bfloat16):
    """CBOW forward: logits = (sum_s E[ids[:, s]]) @ W^T + b.

    ids:       (B, S) int32
    emb_table: (V, D) float32
    weight:    (C, D) float32   (torch nn.Linear layout)
    bias:      (C,)   float32
    returns    (B, C) float32
    """
    B, S = ids.shape
    V, D = emb_table.shape
    C = weight.shape[0]

    # Fold the projector into the embedding table once: (V, D) @ (D, C) -> (V, C).
    folded = jnp.dot(emb_table, weight.T, preferred_element_type=jnp.float32)

    # Lane-dense class padding; sublane-aligned batch / vocab padding.
    cp = _round_up(C, 128)
    bt = min(_round_up(B, 8), 128)
    bp = _round_up(B, bt)
    if block_v is None:
        # Largest vocab tile whose double-buffered bf16 block stays well under
        # the scoped VMEM budget on every generation (v7x: 64 MiB physical).
        block_v = max(8, min(_round_up(V, 8),
                             (4 * 1024 * 1024) // (cp * 2) // 8 * 8))
    vt = block_v
    vp = _round_up(V, vt)

    folded_p = jnp.pad(folded, ((0, vp - V), (0, cp - C))).astype(fold_dtype)
    bias_p = jnp.pad(bias.reshape(1, C).astype(jnp.float32),
                     ((0, 0), (0, cp - C)))
    ids_p = jnp.pad(ids.astype(jnp.int32), ((0, bp - B), (0, 0)))

    grid = (bp // bt, vp // vt)

    out = pl.pallas_call(
        cbow_kernel,
        out_shape=jax.ShapeDtypeStruct((bp, cp), jnp.float32),
        grid_spec=pltpu.PrefetchScalarGridSpec(
            num_scalar_prefetch=0,
            grid=grid,
            in_specs=[
                pl.BlockSpec((bt, S), lambda bi, vi: (bi, 0)),    # ids
                pl.BlockSpec((vt, cp), lambda bi, vi: (vi, 0)),   # folded table tile
                pl.BlockSpec((1, cp), lambda bi, vi: (0, 0)),     # bias
            ],
            out_specs=pl.BlockSpec((bt, cp), lambda bi, vi: (bi, 0)),
            scratch_shapes=[pltpu.VMEM((bt, cp), jnp.float32)],
        ),
        compiler_params=pltpu.CompilerParams(
            dimension_semantics=("parallel", "arbitrary"),
            vmem_limit_bytes=32 * 1024 * 1024,
        ),
    )(ids_p, folded_p, bias_p)

    return out[:B, :C]


if __name__ == "__main__":
    vocab_size = 64
    embedding_dim = 32
    num_classes = 5
    batch = 4
    seq = 8

    key = jax.random.PRNGKey(0)
    k_ids, k_emb, k_w, k_b = jax.random.split(key, 4)

    ids = jax.random.randint(k_ids, (batch, seq), 0, vocab_size, dtype=jnp.int32)

    # nn.Embedding default init: N(0, 1)
    emb_table = jax.random.normal(k_emb, (vocab_size, embedding_dim),
                                  dtype=jnp.float32)

    # nn.Linear default init: U(-1/sqrt(in_features), 1/sqrt(in_features))
    bound = 1.0 / np.sqrt(embedding_dim)
    w = jax.random.uniform(k_w, (num_classes, embedding_dim),
                           minval=-bound, maxval=bound, dtype=jnp.float32)
    b = jax.random.uniform(k_b, (num_classes,),
                           minval=-bound, maxval=bound, dtype=jnp.float32)

    # block_v=32 exercises the V-tiled accumulation path (two reduction steps).
    logits = cbow_forward(ids, emb_table, w, b, block_v=32)
    logits = jax.block_until_ready(logits)

    # Pure-JAX reference of the PyTorch forward (f32 throughout).
    ref = jnp.take(emb_table, ids, axis=0).sum(axis=1) @ w.T + b

    # Tolerance sized for the bf16 folded-table operand (f32 accumulation).
    np.testing.assert_allclose(np.asarray(logits), np.asarray(ref),
                               rtol=5e-2, atol=5e-2)

    print("KERNEL_OK")
</pallas_src>

<mosaic_0001>
module attributes {stable_mosaic.version = 11 : i64} {
  func.func @cbow_kernel(%arg0: i32, %arg1: i32, %arg2: memref<8x8xi32, #tpu.memory_space<vmem>>, %arg3: memref<32x128xbf16, #tpu.memory_space<vmem>>, %arg4: memref<1x128xf32, #tpu.memory_space<vmem>>, %arg5: memref<8x128xf32, #tpu.memory_space<vmem>>, %arg6: memref<8x128xf32, #tpu.memory_space<vmem>>) attributes {dimension_semantics = [#tpu.dimension_semantics<parallel>, #tpu.dimension_semantics<arbitrary>], iteration_bounds = array<i64: 1, 2>, scalar_prefetch = 0 : i64, scratch_operands = 1 : i64, tpu.core_type = #tpu.core_type<tc>, window_params = [{transform_indices = @transform_0, window_bounds = array<i64: 8, 8>}, {transform_indices = @transform_1, window_bounds = array<i64: 32, 128>}, {pipeline_mode = #tpu.pipeline_mode<synchronous>, transform_indices = @transform_2, window_bounds = array<i64: 1, 128>}, {transform_indices = @transform_3, window_bounds = array<i64: 8, 128>}]} {
    %c0_i32 = arith.constant 0 : i32
    %0 = arith.cmpi eq, %arg1, %c0_i32 : i32
    %1 = arith.extui %0 : i1 to i32
    %c0_i32_0 = arith.constant 0 : i32
    %2 = arith.cmpi ne, %1, %c0_i32_0 : i32
    scf.if %2 {
      %cst_10 = arith.constant 0.000000e+00 : f32
      %66 = vector.broadcast %cst_10 : f32 to vector<8x128xf32>
      %c0_11 = arith.constant 0 : index
      %c0_12 = arith.constant 0 : index
      %67 = vector.load %arg6[%c0_11, %c0_12] : memref<8x128xf32, #tpu.memory_space<vmem>>, vector<8x128xf32>
      tpu.vector_store %arg6[%c0_11, %c0_12], %66 {strides = array<i32>} : memref<8x128xf32, #tpu.memory_space<vmem>>, vector<8x128xf32>,
    } else {
    }
    %c0 = arith.constant 0 : index
    %c0_1 = arith.constant 0 : index
    %3 = vector.load %arg2[%c0, %c0_1] : memref<8x8xi32, #tpu.memory_space<vmem>>, vector<8x8xi32>
    %c32_i32 = arith.constant 32 : i32
    %4 = arith.muli %arg1, %c32_i32 : i32
    %5 = tpu.iota {dimensions = array<i32: 1>} : vector<8x32xi32>
    %6 = vector.broadcast %4 : i32 to vector<8x32xi32>
    %7 = arith.addi %5, %6 : vector<8x32xi32>
    %cst = arith.constant 0.000000e+00 : f32
    %8 = vector.broadcast %cst : f32 to vector<8x32xf32>
    %9 = vector.extract_strided_slice %3 {offsets = [0, 0], sizes = [8, 1], strides = [1, 1]} : vector<8x8xi32> to vector<8x1xi32>
    %10 = vector.broadcast %9 : vector<8x1xi32> to vector<8x32xi32>
    %11 = arith.cmpi eq, %7, %10 : vector<8x32xi32>
    %12 = arith.extui %11 : vector<8x32xi1> to vector<8x32xi32>
    %13 = arith.sitofp %12 : vector<8x32xi32> to vector<8x32xf32>
    %14 = arith.addf %8, %13 : vector<8x32xf32>
    %15 = vector.extract_strided_slice %3 {offsets = [0, 1], sizes = [8, 1], strides = [1, 1]} : vector<8x8xi32> to vector<8x1xi32>
    %16 = vector.broadcast %15 : vector<8x1xi32> to vector<8x32xi32>
    %17 = arith.cmpi eq, %7, %16 : vector<8x32xi32>
    %18 = arith.extui %17 : vector<8x32xi1> to vector<8x32xi32>
    %19 = arith.sitofp %18 : vector<8x32xi32> to vector<8x32xf32>
    %20 = arith.addf %14, %19 : vector<8x32xf32>
    %21 = vector.extract_strided_slice %3 {offsets = [0, 2], sizes = [8, 1], strides = [1, 1]} : vector<8x8xi32> to vector<8x1xi32>
    %22 = vector.broadcast %21 : vector<8x1xi32> to vector<8x32xi32>
    %23 = arith.cmpi eq, %7, %22 : vector<8x32xi32>
    %24 = arith.extui %23 : vector<8x32xi1> to vector<8x32xi32>
    %25 = arith.sitofp %24 : vector<8x32xi32> to vector<8x32xf32>
    %26 = arith.addf %20, %25 : vector<8x32xf32>
    %27 = vector.extract_strided_slice %3 {offsets = [0, 3], sizes = [8, 1], strides = [1, 1]} : vector<8x8xi32> to vector<8x1xi32>
    %28 = vector.broadcast %27 : vector<8x1xi32> to vector<8x32xi32>
    %29 = arith.cmpi eq, %7, %28 : vector<8x32xi32>
    %30 = arith.extui %29 : vector<8x32xi1> to vector<8x32xi32>
    %31 = arith.sitofp %30 : vector<8x32xi32> to vector<8x32xf32>
    %32 = arith.addf %26, %31 : vector<8x32xf32>
    %33 = vector.extract_strided_slice %3 {offsets = [0, 4], sizes = [8, 1], strides = [1, 1]} : vector<8x8xi32> to vector<8x1xi32>
    %34 = vector.broadcast %33 : vector<8x1xi32> to vector<8x32xi32>
    %35 = arith.cmpi eq, %7, %34 : vector<8x32xi32>
    %36 = arith.extui %35 : vector<8x32xi1> to vector<8x32xi32>
    %37 = arith.sitofp %36 : vector<8x32xi32> to vector<8x32xf32>
    %38 = arith.addf %32, %37 : vector<8x32xf32>
    %39 = vector.extract_strided_slice %3 {offsets = [0, 5], sizes = [8, 1], strides = [1, 1]} : vector<8x8xi32> to vector<8x1xi32>
    %40 = vector.broadcast %39 : vector<8x1xi32> to vector<8x32xi32>
    %41 = arith.cmpi eq, %7, %40 : vector<8x32xi32>
    %42 = arith.extui %41 : vector<8x32xi1> to vector<8x32xi32>
    %43 = arith.sitofp %42 : vector<8x32xi32> to vector<8x32xf32>
    %44 = arith.addf %38, %43 : vector<8x32xf32>
    %45 = vector.extract_strided_slice %3 {offsets = [0, 6], sizes = [8, 1], strides = [1, 1]} : vector<8x8xi32> to vector<8x1xi32>
    %46 = vector.broadcast %45 : vector<8x1xi32> to vector<8x32xi32>
    %47 = arith.cmpi eq, %7, %46 : vector<8x32xi32>
    %48 = arith.extui %47 : vector<8x32xi1> to vector<8x32xi32>
    %49 = arith.sitofp %48 : vector<8x32xi32> to vector<8x32xf32>
    %50 = arith.addf %44, %49 : vector<8x32xf32>
    %51 = vector.extract_strided_slice %3 {offsets = [0, 7], sizes = [8, 1], strides = [1, 1]} : vector<8x8xi32> to vector<8x1xi32>
    %52 = vector.broadcast %51 : vector<8x1xi32> to vector<8x32xi32>
    %53 = arith.cmpi eq, %7, %52 : vector<8x32xi32>
    %54 = arith.extui %53 : vector<8x32xi1> to vector<8x32xi32>
    %55 = arith.sitofp %54 : vector<8x32xi32> to vector<8x32xf32>
    %56 = arith.addf %50, %55 : vector<8x32xf32>
    %c0_2 = arith.constant 0 : index
    %c0_3 = arith.constant 0 : index
    %57 = vector.load %arg6[%c0_2, %c0_3] : memref<8x128xf32, #tpu.memory_space<vmem>>, vector<8x128xf32>
    %58 = arith.truncf %56 : vector<8x32xf32> to vector<8x32xbf16>
    %c0_4 = arith.constant 0 : index
    %c0_5 = arith.constant 0 : index
    %59 = vector.load %arg3[%c0_4, %c0_5] : memref<32x128xbf16, #tpu.memory_space<vmem>>, vector<32x128xbf16>
    %cst_6 = arith.constant dense<0.000000e+00> : vector<8x128xf32>
    %60 = tpu.matmul %58, %59, %cst_6 {dimension_numbers = #tpu.dot_dimension_numbers<[1], [0], [0], [1], [0, 0, 1, 1], [], []>} : vector<8x32xbf16>, vector<32x128xbf16>, vector<8x128xf32> -> vector<8x128xf32>
    %61 = arith.addf %57, %60 : vector<8x128xf32>
    %c0_7 = arith.constant 0 : index
    %c0_8 = arith.constant 0 : index
    %62 = vector.load %arg6[%c0_7, %c0_8] : memref<8x128xf32, #tpu.memory_space<vmem>>, vector<8x128xf32>
    tpu.vector_store %arg6[%c0_7, %c0_8], %61 {strides = array<i32>} : memref<8x128xf32, #tpu.memory_space<vmem>>, vector<8x128xf32>,
    %c1_i32 = arith.constant 1 : i32
    %63 = arith.cmpi eq, %arg1, %c1_i32 : i32
    %64 = arith.extui %63 : i1 to i32
    %c0_i32_9 = arith.constant 0 : i32
    %65 = arith.cmpi ne, %64, %c0_i32_9 : i32
    scf.if %65 {
      %c0_10 = arith.constant 0 : index
      %c0_11 = arith.constant 0 : index
      %66 = vector.load %arg6[%c0_10, %c0_11] : memref<8x128xf32, #tpu.memory_space<vmem>>, vector<8x128xf32>
      %c0_12 = arith.constant 0 : index
      %c0_13 = arith.constant 0 : index
      %67 = vector.load %arg4[%c0_12, %c0_13] : memref<1x128xf32, #tpu.memory_space<vmem>>, vector<1x128xf32>
      %68 = vector.broadcast %67 : vector<1x128xf32> to vector<8x128xf32>
      %69 = arith.addf %66, %68 : vector<8x128xf32>
      %c0_14 = arith.constant 0 : index
      %c0_15 = arith.constant 0 : index
      %70 = vector.load %arg5[%c0_14, %c0_15] : memref<8x128xf32, #tpu.memory_space<vmem>>, vector<8x128xf32>
      tpu.vector_store %arg5[%c0_14, %c0_15], %69 {strides = array<i32>} : memref<8x128xf32, #tpu.memory_space<vmem>>, vector<8x128xf32>,
    } else {
    }
    return
  }
  func.func @transform_0(%arg0: i32, %arg1: i32) -> (i32, i32) {
    %c0_i32 = arith.constant 0 : i32
    %c0_i32_0 = arith.constant 0 : i32
    return %arg0, %c0_i32 : i32, i32
  }
  func.func @transform_1(%arg0: i32, %arg1: i32) -> (i32, i32) {
    %c0_i32 = arith.constant 0 : i32
    %c0_i32_0 = arith.constant 0 : i32
    return %arg1, %c0_i32 : i32, i32
  }
  func.func @transform_2(%arg0: i32, %arg1: i32) -> (i32, i32) {
    %c0_i32 = arith.constant 0 : i32
    %c0_i32_0 = arith.constant 0 : i32
    %c0_i32_1 = arith.constant 0 : i32
    return %c0_i32, %c0_i32_0 : i32, i32
  }
  func.func @transform_3(%arg0: i32, %arg1: i32) -> (i32, i32) {
    %c0_i32 = arith.constant 0 : i32
    %c0_i32_0 = arith.constant 0 : i32
    return %arg0, %c0_i32 : i32, i32
  }
}

</mosaic_0001>

<bundles_post_ra>
// kernel: tpu_custom_call.1
= control target key start
LH: loop header
LB: loop body
LE: loop exit
PB: predicated region body
PF: predicated region fallthrough
CT: control target
= control target key end

     0   :  { %8 = vsyncpa [#allocation4], 0  ;;  %s869_s0 = inlined_call_operand.hbm [shape: s32[8,8], index: 0, kind: input, shape index: {}]   ;;  %s870_s1 = inlined_call_operand.hbm [shape: bf16[64,128], index: 1, kind: input, shape index: {}]   ;;  %s871_s2 = inlined_call_operand.vmem [shape: f32[1,128], index: 2, kind: input, shape index: {}]   ;;  %s872_s3 = inlined_call_operand.hbm [shape: f32[8,128], index: 3, kind: output, shape index: {}]  }
   0x1   :  { %9 = vsyncpa [#allocation7], 0 }
   0x2   :  { %11 = vsyncpa [#allocation7 + $0x1], 0 }
   0x3   :  { %12 = vsyncpa [#allocation5], 0  ;;  %s735_s12 = smov 0   ;;  %s737_s13 = smov 0  }
   0x4   :  { %s739_s14 = smov 0   ;;  %s741_s15 = smov 0  }
   0x5   :  { %s743_s16 = smov 0   ;;  %s745_s17 = smov 0  }
   0x6 LB: > { %s421_s18 = sadd.s32 4294967295, %s699_s17   ;;  %s63_s19 = sadd.s32 1, %s687_s14  ;;  %s699_s17 = sphi %s745_s17, %s18_s17   ;;  %s695_s16 = sphi %s743_s16, %s882_s16   ;;  %s691_s15 = sphi %s741_s15, %s881_s15   ;;  %s687_s14 = sphi %s739_s14, %s880_s14   ;;  %s683_s13 = sphi %s737_s13, %s879_s13   ;;  %s679_s12 = sphi %s735_s12, %s878_s12  }
   0x7   : > { %p70_p0 = scmp.ne.s32.totalorder %s687_s14, %s683_s13  ;;  %p71_p1 = scmp.eq.s32.totalorder %s699_s17, 0 }
   0x8   : > { %p76_p2 = scmp.ne.s32.totalorder %s683_s13, %s679_s12  ;;  %p771_p3 = scmp.eq.s32.totalorder %s421_s18, 0 }
   0x9   : > { %p775_p4 = por %p71_p1, %p70_p0  ;;  %p422_p5 = scmp.ge.s32.totalorder %s699_s17, 1 }
   0xa   : > { %p782_p6 = por %p771_p3, %p76_p2  ;;  %p134_p7 = scmp.lt.s32.totalorder %s699_s17, 3 }
   0xb   : > { %s148_s25 = sshll.u32 %s869_s0, 4  ;;  %s701_s27 = smov [#allocation3]   ;;  %s149_s25 = int_to_ptr.hbm [resolvable:$true] %s148_s25 }
   0xc   : > { %p790_p8 = pnand %p422_p5, %p134_p7  ;;  %s150_s28 = sshll.u32 %s701_s27, 4  ;;  %s151_s28 = int_to_ptr.vmem [resolvable:$true] %s150_s28 }
   0xd   : > { %p477_p10 = scmp.lt.s32.totalorder %s699_s17, 2  ;;  %s27_s30 = sadd.s32 1, %s695_s16 }
   0xe   : > { %p468_p9 = pneg %p790_p8  ;;  %p28_p13 = scmp.ge.s32.totalorder %s27_s30, 2 }
   0xf   : > { %p801_p12 = pnand %p477_p10, %p775_p4  ;;  %s164_s4 = sand.u32 1, %s687_s14  }
  0x10   : > { %p469_p11 = pnand %p468_p9, %p771_p3  ;;  %s455_s5 = sshll.u32 %s695_s16, 4 }
  0x11   : > { %s884_s30 = smov (%p28_p13, %s27_s30), 0  ;;  %s425_s6 = sshll.u32 %s164_s4, 4 }
  0x12   : > { %471 = dma.hbm_to_vmem [thread:$0]  (!%p469_p11), %s149_s25, 128, %s151_s28, [#allocation4]  }
  0x13   : > { %s60_s7 = ssub.s32 %s695_s16, %s884_s30  ;;  %s173_s10 = scalar_lea.hbm %s870_s1, %s455_s5 }
  0x14   : > { %p61_p0 = scmp.eq.s32.totalorder %s60_s7, 0  ;;  %s174_s11 = sshll.u32 %s173_s10, 4  ;;  %s175_s11 = int_to_ptr.hbm [resolvable:$true] %s174_s11 }
  0x15   : > { %s168_s12 = scalar_lea.vmem [#allocation6], %s425_s6  ;;  %s165_s24 = scalar_lea.sflag [#allocation7], %s164_s4 }
  0x16   : > { %s176_s21 = sshll.u32 %s168_s12, 4  ;;  %s702_s25 = smov 64   ;;  %s177_s21 = int_to_ptr.vmem [resolvable:$true] %s176_s21 }
  0x17   : > { %s818_s23 = scalar_select %p61_p0, %s687_s14, %s63_s19  }
  0x18   : > { %s703_s27 = smov 4   ;;  %188 = sbr.rel (%p790_p8) target bundleno = 332 (0x14c), region = 32 }
  0x19   : > { %475 = dma.hbm_to_vmem [thread:$0]  (!%p801_p12), %s175_s11, 256, %s177_s21, %s165_s24, %s702_s25, %s702_s25, %s703_s27  }
  0x1d   : > { %666 = dma.done.wait (%p771_p3), [#allocation4], 128  }
  0x1e   : > { %668 = vsyncadd (%p771_p3), [#allocation4], 4294967168  ;;  %s195_s19 = sand.u32 1, %s683_s13  }
  0x1f   : > { %s829_s28 = sshll.u32 %s195_s19, 4  ;;  %s196_s4 = scalar_lea.sflag [#allocation7], %s195_s19 }
  0x20   : > { %s199_s5 = scalar_lea.vmem [#allocation6], %s829_s28 }
  0x21   : > { %670 = dma.done.wait (%p782_p6), %s196_s4, 256  }
  0x22   : > { %672 = vsyncadd (%p782_p6), %s196_s4, 4294967040  ;;  %p431_p1 = scmp.ne.s32.totalorder %s691_s15, 0 }
  0x24   : > { %223 = sbr.rel (%p431_p1) target bundleno = 43 (0x2b), region = 44 }
  0x29   : > { %v704_v0 = vmov 0.0  }
  0x2a   : > { %224 = vst [vmem:[#allocation2] sm:$0xff] %v704_v0 }
  0x2b PF: > { %v225_v1 = vld [vmem:[#allocation3] sm:$0xff]  ;;  %v705_v2 = vmov 0   ;;  %v706_v3 = vmov 2   ;;  %v707_v4 = vmov 4   ;;  %v708_v5 = vmov 1   ;;  %v456_v11 = vld [vmem:[%s199_s5] sm:$0xff] }
  0x2c   : > { %543 = vset.pattern.permute.xlu0 %v705_v2  ;;  %545 = vset.pattern.permute.xlu1 %v706_v3  ;;  %v709_v6 = vmov 3   ;;  %v710_v7 = vmov 5   ;;  %v711_v8 = vmov 6   ;;  %v712_v9 = vmov 7   ;;  %v457_v10 = vld [vmem:[%s199_s5 + $0x8] sm:$0xff]  ;;  %s432_s20 = sshll.u32 %s691_s15, 5 }
  0x2d   : > { %232 = vperm.xlu0 %543, %v225_v1   ;;  %246 = vperm.xlu1 %545, %v225_v1   ;;  %v227_v13 = vlaneseq  ;;  %v229_v17 = vstv %s432_s20  ;;  %v713_v22 = vmov 0.0   ;;  %vm305_vm8 = vcmask 261120   ;;  %p450_p2 = scmp.ne.s32.totalorder %s691_s15, 1 }
  0x2e   : > { %547 = vset.pattern.permute.xlu2 %v707_v4  ;;  %315 = vmatpush.bf16.msra.mxu0 %v457_v10 }
  0x2f   : > { %260 = vperm.xlu2 %547, %v225_v1   ;;  %v228_v14 = vand.u32 127, %v227_v13 }
  0x31   : > { %v230_v18 = vadd.s32 %v229_v17, %v228_v14  ;;  %v287_v41 = vld [vmem:[#allocation2] sm:$0xff] }
  0x32   : > { %316 = vmatpush.bf16.msra.mxu0 %v456_v11 }
  0x35   : > { %544 = vset.pattern.permute.xlu0 %v708_v5  ;;  %546 = vset.pattern.permute.xlu1 %v709_v6 }
  0x36   : > { %239 = vperm.xlu0 %544, %v225_v1   ;;  %253 = vperm.xlu1 %546, %v225_v1  }
  0x37   : > { %548 = vset.pattern.permute.xlu2 %v710_v7 }
  0x38   : > { %267 = vperm.xlu2 %548, %v225_v1  }
  0x3e   : > { %549 = vset.pattern.permute.xlu1 %v711_v8  ;;  %551 = vset.pattern.permute.xlu0 %v712_v9 }
  0x3f   : > { %274 = vperm.xlu1 %549, %v225_v1  }
  0x40   : > { %550 = vset.pattern.permute.xlu2 %v712_v9 }
  0x41   : > { %281 = vperm.xlu2 %550, %v225_v1  }
  0x89   : > { %v261_v12 = vpop.permute.xlu2 %260 }
  0x8a   : > { %vm262_vm4 = vcmp.eq.s32.totalorder %v230_v18, %v261_v12 }
  0x8b   : > { %v437_v31 = vsel %vm262_vm4, 1.0, %v713_v22 }
  0x92   : > { %v268_v19 = vpop.permute.xlu2 %267 }
  0x93   : > { %vm269_vm5 = vcmp.eq.s32.totalorder %v230_v18, %v268_v19 }
  0x94   : > { %v438_v34 = vsel %vm269_vm5, 1.0, %v713_v22 }
  0x9b   : > { %v282_v29 = vpop.permute.xlu2 %281 }
  0x9c   : > { %vm283_vm6 = vcmp.eq.s32.totalorder %v230_v18, %v282_v29 }
  0x9d   : > { %v440_v37 = vsel %vm283_vm6, 1.0, %v713_v22 }
  0x9f   : > { %v233_v15 = vpop.permute.xlu0 %232  ;;  %v247_v16 = vpop.permute.xlu1 %246 }
  0xa0   : > { %vm234_vm0 = vcmp.eq.s32.totalorder %v230_v18, %v233_v15  ;;  %vm248_vm1 = vcmp.eq.s32.totalorder %v230_v18, %v247_v16 }
  0xa1   : > { %v433_v23 = vsel %vm234_vm0, 1.0, %v713_v22  ;;  %v435_v26 = vsel %vm248_vm1, 1.0, %v713_v22 }
  0xa8   : > { %v240_v20 = vpop.permute.xlu0 %239  ;;  %v254_v21 = vpop.permute.xlu1 %253 }
  0xa9   : > { %vm241_vm2 = vcmp.eq.s32.totalorder %v230_v18, %v240_v20  ;;  %vm255_vm3 = vcmp.eq.s32.totalorder %v230_v18, %v254_v21 }
  0xaa   : > { %v434_v24 = vsel %vm241_vm2, 1.0, %v713_v22  ;;  %v436_v28 = vsel %vm255_vm3, 1.0, %v713_v22 }
  0xab   : > { %v244_v25 = vadd.f32 %v434_v24, %v433_v23 }
  0xad   : > { %v251_v27 = vadd.f32 %v435_v26, %v244_v25 }
  0xaf   : > { %v258_v30 = vadd.f32 %v436_v28, %v251_v27 }
  0xb1   : > { %v265_v32 = vadd.f32 %v437_v31, %v258_v30  ;;  %v275_v33 = vpop.permute.xlu1 %274 }
  0xb2   : > { %vm276_vm7 = vcmp.eq.s32.totalorder %v230_v18, %v275_v33 }
  0xb3   : > { %v272_v35 = vadd.f32 %v438_v34, %v265_v32  ;;  %v439_v36 = vsel %vm276_vm7, 1.0, %v713_v22 }
  0xb5   : > { %v279_v38 = vadd.f32 %v439_v36, %v272_v35 }
  0xb7   : > { %v286_v39 = vadd.f32 %v440_v37, %v279_v38 }
  0xb9   : > { %v288_v40 = vpack.c.bf16 %v286_v39, %v286_v39 }
  0xbb   : > { %449 = vmatmul.msk.bf16.vlgmr.msra.gmra.mxu0 %vm305_vm8, %v288_v40 }
 0x138   : > { %v318_v42 = vpop.f32.mrf.mxu0 }
 0x139   : > { %v322_v43 = vadd.f32 %v318_v42, %v287_v41 }
 0x13b   : > { %323 = vst [vmem:[#allocation2] sm:$0xff] %v322_v43 }
 0x13c   : > { %327 = sbr.rel (%p450_p2) target bundleno = 326 (0x146), region = 48 }
 0x140   : > { %v320_v44 = vpop.f32.mrf.mxu0 }
 0x141   : > { %v552_v46 = vld [vmem:[%s871_s2] ss:$0 sm:$0xff] }
 0x142   : > { %v328_v45 = vld [vmem:[#allocation2] sm:$0xff] }
 0x143   : > { %v333_v47 = vadd.f32 %v552_v46, %v328_v45 }
 0x145   : > { %334 = vst [vmem:[#allocation8] sm:$0xff] %v333_v47 }
 0x146 PF: > { %p479_p3 = scmp.eq.s32.totalorder %s421_s18, 1  ;;  %s345_s7 = sshll.u32 %s872_s3, 4  ;;  %s346_s7 = int_to_ptr.hbm [resolvable:$true] %s345_s7 }
 0x147   : > { %s714_s8 = smov [#allocation8]  }
 0x148   : > { %s343_s9 = sshll.u32 %s714_s8, 4  ;;  %s344_s9 = int_to_ptr.vmem [resolvable:$true] %s343_s9 }
 0x149   : > { %465 = dma.vmem_to_hbm [thread:$0]  (%p479_p3), %s344_s9, 128, %s346_s7, [#allocation5]  }
 0x14a   : > { %674 = dma.done.wait (%p479_p3), [#allocation5], 128  }
 0x14b   : > { %676 = vsyncadd (%p479_p3), [#allocation5], 4294967168 }
 0x14c PF: > { %s18_s17 = sadd.s32 1, %s699_s17   ;;  %s878_s12 = smov %s683_s13 }
 0x14d   : > { %p15_p4 = scmp.ge.s32.totalorder %s18_s17, 4   ;;  %s879_s13 = smov %s687_s14 }
 0x14e   : > { %s880_s14 = smov %s818_s23  ;;  %s881_s15 = smov %s695_s16 }
 0x14f   : > { %s882_s16 = smov %s884_s30  ;;  %17 = sbr.rel (!%p15_p4) target bundleno = 6 (0x6), region = 84 }
 0x154   :  { %359 = vsyncpa [#allocation4], 1 }
 0x155   :  { %361 = vsyncpa [#allocation4 + $0x1], 1 }
 0x156   :  { %362 = vsyncpa [#allocation7], 1 }
 0x157   :  { %364 = vsyncpa [#allocation7 + $0x1], 1 }
 0x158   :  { %365 = vsyncpa [#allocation5], 1 }
 0x159   :  { %367 = vsyncpa [#allocation5 + $0x1], 1 }

</bundles_post_ra>
